<compile_context>
chip_gen: v7x
topology: tpu7x:2x2x1
jax: 0.10.0
libtpu: 0.0.40
codegen_flags: <defaults>
</compile_context>

<pallas_src>
import jax
import jax.numpy as jnp
from jax import lax
from jax.experimental import pallas as pl
from jax.experimental.pallas import tpu as pltpu


def _round_up(a: int, b: int) -> int:
    return (a + b - 1) // b * b


def _vmem_capacity_bytes() -> int:
    """Physical VMEM per core (128 MiB v5e/v6e, 64 MiB v7x); conservative fallback."""
    try:
        info = pltpu.get_tpu_info()
        cap = getattr(info, "vmem_capacity_bytes", None)
        if cap:
            return int(cap)
    except Exception:
        pass
    return 64 << 20


def _mlp_kernel(x_ref, w1_ref, b1_ref, w2_ref, b2_ref, w3_ref, b3_ref, o_ref):
    """Fused 3-layer MLP on one batch tile.

    x_ref : (tile_m, d_in)   natural layout (no wrapper transpose)
    wi_ref: (out_i, in_i)    nn.Linear layout, resident across the grid
    bi_ref: (out_i, 1)       f32 (epilogue stays f32)
    o_ref : (tile_m, d_out)  natural layout
    """
    x = x_ref[...]
    # Layer 1: contract the feature dims directly (w1 @ x^T) -> (d_h1, tile_m).
    # The MXU consumes the transposed operand; from here on the batch sits on the
    # lane axis, so all intermediates are lane-dense.
    h = lax.dot_general(w1_ref[...], x, (((1,), (1,)), ((), ())),
                        preferred_element_type=jnp.float32)
    h = jnp.maximum(h + b1_ref[...], 0.0)                       # f32 bias + ReLU
    h = jnp.dot(w2_ref[...], h.astype(w2_ref.dtype),
                preferred_element_type=jnp.float32)
    h = jnp.maximum(h + b2_ref[...], 0.0)                       # f32 bias + ReLU
    y = jnp.dot(w3_ref[...], h.astype(w3_ref.dtype),
                preferred_element_type=jnp.float32)
    y = y + b3_ref[...]                                         # (d_out, tile_m), f32
    # Relayout to the natural output orientation in-kernel (XLU transpose is cheap
    # here and avoids a wrapper-side HBM transpose pass).
    o_ref[...] = y.T.astype(o_ref.dtype)


def mlp_forward(x, params, *, tile_m=16384):
    """params = (w1, b1, w2, b2, w3, b3) with wi (out_i, in_i), bi (out_i,).

    x may be f32 or bf16; the MXU operand dtype follows x.dtype (bf16 at the HBM
    boundary halves x/y traffic), accumulation and the epilogue are f32.
    """
    w1, b1, w2, b2, w3, b3 = params
    B, d_in = x.shape
    d_h1, d_h2, d_out = w1.shape[0], w2.shape[0], w3.shape[0]

    # Hoisted, once-per-call parameter prep (tiny arrays; NOT per-grid-step casts).
    cdt = x.dtype
    w1c, w2c, w3c = (w.astype(cdt) for w in (w1, w2, w3))
    b1c = b1.astype(jnp.float32).reshape(d_h1, 1)
    b2c = b2.astype(jnp.float32).reshape(d_h2, 1)
    b3c = b3.astype(jnp.float32).reshape(d_out, 1)

    itemsize = jnp.dtype(cdt).itemsize

    # --- tile sizing against a per-generation VMEM budget -----------------------
    # Per batch row of VMEM:
    #   * natural-layout x / y blocks are lane-padded to 128 and double-buffered,
    #   * the transposed (features, tile_m) intermediates are lane-dense f32,
    #   * staging for the transposed output before the store.
    per_row_vmem = (
        2 * _round_up(d_in, 128) * itemsize          # x tile (double-buffered)
        + 2 * _round_up(d_out, 128) * itemsize       # y tile (double-buffered)
        + 4 * (d_in + 2 * (d_h1 + d_h2) + d_out)     # lane-dense f32 intermediates
        + 4 * _round_up(d_out, 128)                  # y^T staging
    )
    vmem_cap = _vmem_capacity_bytes()
    vmem_budget = min(int(vmem_cap * 0.6), 80 << 20)
    vmem_limit = int(min(vmem_cap * 0.85, 100 << 20))

    tile_m = _round_up(max(int(tile_m), 128), 128)
    tile_m = min(tile_m, max(1024, (vmem_budget // per_row_vmem) // 128 * 128))
    if B >= 4096:                                    # >= 2 grid steps -> both v7x TCs work
        tile_m = min(tile_m, _round_up(pl.cdiv(B, 2), 128))
    tile_m = min(tile_m, _round_up(B, 128))
    n_steps = pl.cdiv(B, tile_m)                     # last block may overhang

    full = lambda i: (0, 0)                          # weights/biases: resident, DMA'd once

    param_bytes = sum(int(p.size) * jnp.dtype(p.dtype).itemsize
                      for p in (w1c, b1c, w2c, b2c, w3c, b3c))
    flops = 2 * B * (d_in * d_h1 + d_h1 * d_h2 + d_h2 * d_out)
    bytes_accessed = (x.size + B * d_out) * itemsize + param_bytes  # params counted once

    return pl.pallas_call(
        _mlp_kernel,
        out_shape=jax.ShapeDtypeStruct((B, d_out), cdt),
        grid=(n_steps,),
        in_specs=[
            pl.BlockSpec((tile_m, d_in), lambda i: (i, 0)),   # natural x batch tile
            pl.BlockSpec((d_h1, d_in), full),
            pl.BlockSpec((d_h1, 1), full),
            pl.BlockSpec((d_h2, d_h1), full),
            pl.BlockSpec((d_h2, 1), full),
            pl.BlockSpec((d_out, d_h2), full),
            pl.BlockSpec((d_out, 1), full),
        ],
        out_specs=pl.BlockSpec((tile_m, d_out), lambda i: (i, 0)),
        compiler_params=pltpu.CompilerParams(
            dimension_semantics=("parallel",),       # shard batch tiles across TCs
            vmem_limit_bytes=vmem_limit,
        ),
        cost_estimate=pl.CostEstimate(
            flops=int(flops), transcendentals=0, bytes_accessed=int(bytes_accessed)
        ),
    )(x, w1c, b1c, w2c, b2c, w3c, b3c)


def init_mlp_params(key, dims, dtype=jnp.float32):
    """Orthogonal weight init (gain=1.0), zero bias — mirrors orthogonal_net().

    Weights are stored in nn.Linear layout: (out_features, in_features)."""
    ortho = jax.nn.initializers.orthogonal(scale=1.0)
    params = []
    for i in range(len(dims) - 1):
        key, sub = jax.random.split(key)
        w = ortho(sub, (dims[i + 1], dims[i]), dtype)
        b = jnp.zeros((dims[i + 1],), dtype)
        params.extend([w, b])
    return tuple(params)


def mlp_reference(x, params):
    """Plain-JAX reference (PyTorch semantics: x @ W.T + b), high-precision matmuls."""
    w1, b1, w2, b2, w3, b3 = params
    hp = jax.lax.Precision.HIGHEST
    h = jnp.maximum(jnp.dot(x, w1.T, precision=hp) + b1, 0.0)
    h = jnp.maximum(jnp.dot(h, w2.T, precision=hp) + b2, 0.0)
    return jnp.dot(h, w3.T, precision=hp) + b3


if __name__ == "__main__":
    # MLP(dims=[16, 32, 32, 8]) with default activation_fn=nn.ReLU,
    # no output activation, no dropout, no layer_norm, no squeeze.
    dims = (16, 32, 32, 8)

    key = jax.random.PRNGKey(0)
    kx1, kx2, kx3, kp = jax.random.split(key, 4)
    params = init_mlp_params(kp, dims, dtype=jnp.float32)

    # Small batch: single overhanging block (block > array rows).
    x1 = jax.random.normal(kx1, (8, dims[0]), dtype=jnp.float32)
    o1 = jax.block_until_ready(mlp_forward(x1, params))
    r1 = mlp_reference(x1, params)
    assert o1.shape == (8, dims[-1])
    assert jnp.allclose(o1, r1, atol=1e-4, rtol=1e-4), "mismatch (small batch)"

    # Non-divisible batch, multiple grid steps + overhanging last block.
    x2 = jax.random.normal(kx2, (1000, dims[0]), dtype=jnp.float32)
    o2 = jax.block_until_ready(mlp_forward(x2, params, tile_m=512))
    r2 = mlp_reference(x2, params)
    assert o2.shape == (1000, dims[-1])
    assert jnp.allclose(o2, r2, atol=1e-4, rtol=1e-4), "mismatch (multi-tile overhang)"

    # Default (large) tile; >= 2 grid steps so both v7x TensorCores get work.
    x3 = jax.random.normal(kx3, (6000, dims[0]), dtype=jnp.float32)
    o3 = jax.block_until_ready(mlp_forward(x3, params))
    r3 = mlp_reference(x3, params)
    assert o3.shape == (6000, dims[-1])
    assert jnp.allclose(o3, r3, atol=1e-4, rtol=1e-4), "mismatch (default tile)"

    # bf16 at the HBM boundary (halves x/y traffic); f32 accumulation + epilogue.
    o4 = jax.block_until_ready(mlp_forward(x3.astype(jnp.bfloat16), params))
    assert o4.dtype == jnp.bfloat16
    assert jnp.allclose(o4.astype(jnp.float32), r3, atol=1e-1, rtol=1e-1), "mismatch (bf16 HBM)"

    print("KERNEL_OK")
</pallas_src>

<mosaic_0001>
module attributes {stable_mosaic.version = 11 : i64} {
  func.func @_mlp_kernel(%arg0: i32, %arg1: memref<128x16xf32, #tpu.memory_space<vmem>>, %arg2: memref<32x16xf32, #tpu.memory_space<vmem>>, %arg3: memref<32x1xf32, #tpu.memory_space<vmem>>, %arg4: memref<32x32xf32, #tpu.memory_space<vmem>>, %arg5: memref<32x1xf32, #tpu.memory_space<vmem>>, %arg6: memref<8x32xf32, #tpu.memory_space<vmem>>, %arg7: memref<8x1xf32, #tpu.memory_space<vmem>>, %arg8: memref<128x8xf32, #tpu.memory_space<vmem>>) attributes {dimension_semantics = [#tpu.dimension_semantics<parallel>], iteration_bounds = array<i64: 1>, scalar_prefetch = 0 : i64, scratch_operands = 0 : i64, tpu.core_type = #tpu.core_type<tc>, window_params = [{transform_indices = @transform_0, window_bounds = array<i64: 128, 16>}, {pipeline_mode = #tpu.pipeline_mode<synchronous>, transform_indices = @transform_1, window_bounds = array<i64: 32, 16>}, {pipeline_mode = #tpu.pipeline_mode<synchronous>, transform_indices = @transform_2, window_bounds = array<i64: 32, 1>}, {pipeline_mode = #tpu.pipeline_mode<synchronous>, transform_indices = @transform_3, window_bounds = array<i64: 32, 32>}, {pipeline_mode = #tpu.pipeline_mode<synchronous>, transform_indices = @transform_4, window_bounds = array<i64: 32, 1>}, {pipeline_mode = #tpu.pipeline_mode<synchronous>, transform_indices = @transform_5, window_bounds = array<i64: 8, 32>}, {pipeline_mode = #tpu.pipeline_mode<synchronous>, transform_indices = @transform_6, window_bounds = array<i64: 8, 1>}, {transform_indices = @transform_7, window_bounds = array<i64: 128, 8>}]} {
    %c0 = arith.constant 0 : index
    %c0_0 = arith.constant 0 : index
    %0 = vector.load %arg1[%c0, %c0_0] : memref<128x16xf32, #tpu.memory_space<vmem>>, vector<128x16xf32>
    %c0_1 = arith.constant 0 : index
    %c0_2 = arith.constant 0 : index
    %1 = vector.load %arg2[%c0_1, %c0_2] : memref<32x16xf32, #tpu.memory_space<vmem>>, vector<32x16xf32>
    %cst = arith.constant dense<0.000000e+00> : vector<32x128xf32>
    %2 = tpu.matmul %1, %0, %cst {dimension_numbers = #tpu.dot_dimension_numbers<[1], [1], [0], [0], [0, 0, 1, 0], [], []>} : vector<32x16xf32>, vector<128x16xf32>, vector<32x128xf32> -> vector<32x128xf32>
    %c0_3 = arith.constant 0 : index
    %c0_4 = arith.constant 0 : index
    %3 = vector.load %arg3[%c0_3, %c0_4] : memref<32x1xf32, #tpu.memory_space<vmem>>, vector<32x1xf32>
    %4 = vector.broadcast %3 : vector<32x1xf32> to vector<32x128xf32>
    %5 = arith.addf %2, %4 : vector<32x128xf32>
    %cst_5 = arith.constant 0.000000e+00 : f32
    %6 = vector.broadcast %cst_5 : f32 to vector<32x128xf32>
    %7 = arith.maximumf %5, %6 : vector<32x128xf32>
    %c0_6 = arith.constant 0 : index
    %c0_7 = arith.constant 0 : index
    %8 = vector.load %arg4[%c0_6, %c0_7] : memref<32x32xf32, #tpu.memory_space<vmem>>, vector<32x32xf32>
    %cst_8 = arith.constant dense<0.000000e+00> : vector<32x128xf32>
    %9 = tpu.matmul %8, %7, %cst_8 {dimension_numbers = #tpu.dot_dimension_numbers<[1], [0], [0], [1], [0, 0, 1, 1], [], []>} : vector<32x32xf32>, vector<32x128xf32>, vector<32x128xf32> -> vector<32x128xf32>
    %c0_9 = arith.constant 0 : index
    %c0_10 = arith.constant 0 : index
    %10 = vector.load %arg5[%c0_9, %c0_10] : memref<32x1xf32, #tpu.memory_space<vmem>>, vector<32x1xf32>
    %11 = vector.broadcast %10 : vector<32x1xf32> to vector<32x128xf32>
    %12 = arith.addf %9, %11 : vector<32x128xf32>
    %cst_11 = arith.constant 0.000000e+00 : f32
    %13 = vector.broadcast %cst_11 : f32 to vector<32x128xf32>
    %14 = arith.maximumf %12, %13 : vector<32x128xf32>
    %c0_12 = arith.constant 0 : index
    %c0_13 = arith.constant 0 : index
    %15 = vector.load %arg6[%c0_12, %c0_13] : memref<8x32xf32, #tpu.memory_space<vmem>>, vector<8x32xf32>
    %cst_14 = arith.constant dense<0.000000e+00> : vector<8x128xf32>
    %16 = tpu.matmul %15, %14, %cst_14 {dimension_numbers = #tpu.dot_dimension_numbers<[1], [0], [0], [1], [0, 0, 1, 1], [], []>} : vector<8x32xf32>, vector<32x128xf32>, vector<8x128xf32> -> vector<8x128xf32>
    %c0_15 = arith.constant 0 : index
    %c0_16 = arith.constant 0 : index
    %17 = vector.load %arg7[%c0_15, %c0_16] : memref<8x1xf32, #tpu.memory_space<vmem>>, vector<8x1xf32>
    %18 = vector.broadcast %17 : vector<8x1xf32> to vector<8x128xf32>
    %19 = arith.addf %16, %18 : vector<8x128xf32>
    %20 = tpu.transpose %19, [1, 0] : vector<8x128xf32> -> vector<128x8xf32>
    %c0_17 = arith.constant 0 : index
    %c0_18 = arith.constant 0 : index
    %21 = vector.load %arg8[%c0_17, %c0_18] : memref<128x8xf32, #tpu.memory_space<vmem>>, vector<128x8xf32>
    tpu.vector_store %arg8[%c0_17, %c0_18], %20 {strides = array<i32>} : memref<128x8xf32, #tpu.memory_space<vmem>>, vector<128x8xf32>,
    return
  }
  func.func @transform_0(%arg0: i32) -> (i32, i32) {
    %c0_i32 = arith.constant 0 : i32
    %c0_i32_0 = arith.constant 0 : i32
    return %arg0, %c0_i32 : i32, i32
  }
  func.func @transform_1(%arg0: i32) -> (i32, i32) {
    %c0_i32 = arith.constant 0 : i32
    %c0_i32_0 = arith.constant 0 : i32
    %c0_i32_1 = arith.constant 0 : i32
    return %c0_i32, %c0_i32_0 : i32, i32
  }
  func.func @transform_2(%arg0: i32) -> (i32, i32) {
    %c0_i32 = arith.constant 0 : i32
    %c0_i32_0 = arith.constant 0 : i32
    %c0_i32_1 = arith.constant 0 : i32
    return %c0_i32, %c0_i32_0 : i32, i32
  }
  func.func @transform_3(%arg0: i32) -> (i32, i32) {
    %c0_i32 = arith.constant 0 : i32
    %c0_i32_0 = arith.constant 0 : i32
    %c0_i32_1 = arith.constant 0 : i32
    return %c0_i32, %c0_i32_0 : i32, i32
  }
  func.func @transform_4(%arg0: i32) -> (i32, i32) {
    %c0_i32 = arith.constant 0 : i32
    %c0_i32_0 = arith.constant 0 : i32
    %c0_i32_1 = arith.constant 0 : i32
    return %c0_i32, %c0_i32_0 : i32, i32
  }
  func.func @transform_5(%arg0: i32) -> (i32, i32) {
    %c0_i32 = arith.constant 0 : i32
    %c0_i32_0 = arith.constant 0 : i32
    %c0_i32_1 = arith.constant 0 : i32
    return %c0_i32, %c0_i32_0 : i32, i32
  }
  func.func @transform_6(%arg0: i32) -> (i32, i32) {
    %c0_i32 = arith.constant 0 : i32
    %c0_i32_0 = arith.constant 0 : i32
    %c0_i32_1 = arith.constant 0 : i32
    return %c0_i32, %c0_i32_0 : i32, i32
  }
  func.func @transform_7(%arg0: i32) -> (i32, i32) {
    %c0_i32 = arith.constant 0 : i32
    %c0_i32_0 = arith.constant 0 : i32
    return %arg0, %c0_i32 : i32, i32
  }
}

</mosaic_0001>

<bundles_post_ra>
// kernel: tpu_custom_call.1
= control target key start
LH: loop header
LB: loop body
LE: loop exit
PB: predicated region body
PF: predicated region fallthrough
CT: control target
= control target key end

     0   :  { %12 = vsyncpa [#allocation3], 0  ;;  %vm71_vm0 = vcmask 130048   ;;  %v712_v6 = vmov 0   ;;  %vm249_vm2 = vcmask 261120   ;;  %v713_v61 = vmov 0.0|0.0   ;;  %s936_s0 = inlined_call_operand.vmem [shape: f32[8,16], index: 0, kind: input, shape index: {}]   ;;  %s937_s1 = inlined_call_operand.vmem [shape: f32[32,16], index: 1, kind: input, shape index: {}]   ;;  %s938_s2 = inlined_call_operand.vmem [shape: f32[32,1], index: 2, kind: input, shape index: {}]   ;;  %s939_s3 = inlined_call_operand.vmem [shape: f32[32,32], index: 3, kind: input, shape index: {}]   ;;  %s940_s4 = inlined_call_operand.vmem [shape: f32[32,1], index: 4, kind: input, shape index: {}]   ;;  %s941_s5 = inlined_call_operand.vmem [shape: f32[8,32], index: 5, kind: input, shape index: {}]   ;;  %s942_s6 = inlined_call_operand.vmem [shape: f32[8,1], index: 6, kind: input, shape index: {}]   ;;  %s943_s7 = inlined_call_operand.hbm [shape: f32[8,8], index: 7, kind: output, shape index: {}]  }
   0x1   :  { %v27_v0 = vld [vmem:[%s936_s0] sm:$0xff]  ;;  %v28_v1 = vld [vmem:[%s936_s0 + $0x8] sm:$0xff]  ;;  %vm767_vm1 = vmpackc.low %vm71_vm0, %vm71_vm0  ;;  %686 = vset.pattern.permute.xlu0 %v712_v6  ;;  %687 = vset.pattern.permute.xlu1 %v712_v6  ;;  %vm714_vm3 = vmmov 0   ;;  %v715_v62 = vmov 0.0   ;;  %vm463_vm4 = vcmask 64512  }
   0x2   :  { %v617_v2 = vpack.c.bf16 %v28_v1, %v27_v0  ;;  %v29_v4 = vld [vmem:[%s936_s0 + $0x10] sm:$0xff]  ;;  %v30_v5 = vld [vmem:[%s936_s0 + $0x18] sm:$0xff]  ;;  %v31_v8 = vld [vmem:[%s936_s0 + $0x20] sm:$0xff] }
   0x3   :  { %v623_v7 = vpack.c.bf16 %v30_v5, %v29_v4  ;;  %v32_v9 = vld [vmem:[%s936_s0 + $0x28] sm:$0xff]  ;;  %v43_v10 = vld [vmem:[%s937_s1] sm:$0xff]  ;;  %v49_v12 = vld [vmem:[%s938_s2 + $0x10] sm:$0xff] }
   0x4   :  { %619 = vmatprep.subr.msk.bf16.mxu0 %vm767_vm1, %v617_v2  ;;  %586 = vmatprep.mubr.msk.f32.mxu0 %vm71_vm0, %v43_v10  ;;  %v47_v11 = vld [vmem:[%s938_s2] sm:$0xff]  ;;  %v629_v13 = vpack.c.bf16 %v32_v9, %v31_v8  ;;  %v48_v14 = vld [vmem:[%s938_s2 + $0x8] sm:$0xff]  ;;  %v50_v15 = vld [vmem:[%s938_s2 + $0x18] sm:$0xff] }
   0x5   :  { %622 = vmatpush3.bf16.xpose.msk.msra.mxu0 %vm767_vm1, %v617_v2  ;;  %53 = vperm.xlu0 %686, %v47_v11   ;;  %v225_v16 = vld [vmem:[%s940_s4] sm:$0xff]  ;;  %v33_v17 = vld [vmem:[%s936_s0 + $0x30] sm:$0xff]  ;;  %v34_v18 = vld [vmem:[%s936_s0 + $0x38] sm:$0xff] }
   0x6   :  { %625 = vmatprep.subr.msk.bf16.mxu0 %vm767_vm1, %v623_v7  ;;  %63 = vperm.xlu1 %687, %v49_v12   ;;  %v226_v19 = vld [vmem:[%s940_s4 + $0x8] sm:$0xff]  ;;  %v635_v20 = vpack.c.bf16 %v34_v18, %v33_v17  ;;  %v227_v21 = vld [vmem:[%s940_s4 + $0x10] sm:$0xff]  ;;  %v228_v22 = vld [vmem:[%s940_s4 + $0x18] sm:$0xff] }
   0x7   :  { %v352_v23 = vld [vmem:[%s942_s6] sm:$0xff]  ;;  %v36_v25 = vld [vmem:[%s936_s0 + $0x48] sm:$0xff]  ;;  %v37_v27 = vld [vmem:[%s936_s0 + $0x50] sm:$0xff] }
   0x8   :  { %v35_v24 = vld [vmem:[%s936_s0 + $0x40] sm:$0xff]  ;;  %v38_v28 = vld [vmem:[%s936_s0 + $0x58] sm:$0xff]  ;;  %v40_v31 = vld [vmem:[%s936_s0 + $0x68] sm:$0xff] }
   0x9   :  { %58 = vperm.xlu0 %686, %v48_v14   ;;  %v641_v26 = vpack.c.bf16 %v36_v25, %v35_v24  ;;  %v647_v29 = vpack.c.bf16 %v38_v28, %v37_v27  ;;  %v39_v30 = vld [vmem:[%s936_s0 + $0x60] sm:$0xff]  ;;  %v41_v33 = vld [vmem:[%s936_s0 + $0x70] sm:$0xff]  ;;  %v42_v34 = vld [vmem:[%s936_s0 + $0x78] sm:$0xff] }
   0xa   :  { %68 = vperm.xlu1 %687, %v50_v15   ;;  %v653_v32 = vpack.c.bf16 %v40_v31, %v39_v30  ;;  %v659_v35 = vpack.c.bf16 %v42_v34, %v41_v33  ;;  %v44_v36 = vld [vmem:[%s937_s1 + $0x8] sm:$0xff]  ;;  %v45_v37 = vld [vmem:[%s937_s1 + $0x10] sm:$0xff]  ;;  %v46_v38 = vld [vmem:[%s937_s1 + $0x18] sm:$0xff] }
   0xb   :  { %v221_v39 = vld [vmem:[%s939_s3] sm:$0xff]  ;;  %v222_v58 = vld [vmem:[%s939_s3 + $0x8] sm:$0xff]  ;;  %v223_v59 = vld [vmem:[%s939_s3 + $0x10] sm:$0xff] }
   0xc   :  { %600 = vmatprep.mubr.msk.f32.mxu1 %vm249_vm2, %v221_v39  ;;  %v224_v60 = vld [vmem:[%s939_s3 + $0x18] sm:$0xff]  ;;  %v351_v17 = vld [vmem:[%s941_s5] sm:$0xff] }
   0xd   :  { %628 = vmatpush3.bf16.xpose.msk.msra.mxu0 %vm767_vm1, %v623_v7  ;;  %231 = vperm.xlu0 %686, %v225_v16  }
   0xe   :  { %631 = vmatprep.subr.msk.bf16.mxu0 %vm767_vm1, %v629_v13  ;;  %236 = vperm.xlu1 %687, %v226_v19  }
  0x11   :  { %241 = vperm.xlu0 %686, %v227_v21  }
  0x12   :  { %246 = vperm.xlu1 %687, %v228_v22  }
  0x15   :  { %634 = vmatpush3.bf16.xpose.msk.msra.mxu0 %vm767_vm1, %v629_v13  ;;  %355 = vperm.xlu0 %686, %v352_v23  }
  0x16   :  { %637 = vmatprep.subr.msk.bf16.mxu0 %vm767_vm1, %v635_v20 }
  0x1d   :  { %640 = vmatpush3.bf16.xpose.msk.msra.mxu0 %vm767_vm1, %v635_v20 }
  0x1e   :  { %643 = vmatprep.subr.msk.bf16.mxu0 %vm767_vm1, %v641_v26 }
  0x25   :  { %646 = vmatpush3.bf16.xpose.msk.msra.mxu0 %vm767_vm1, %v641_v26 }
  0x26   :  { %649 = vmatprep.subr.msk.bf16.mxu0 %vm767_vm1, %v647_v29 }
  0x2d   :  { %652 = vmatpush3.bf16.xpose.msk.msra.mxu0 %vm767_vm1, %v647_v29 }
  0x2e   :  { %655 = vmatprep.subr.msk.bf16.mxu0 %vm767_vm1, %v653_v32 }
  0x35   :  { %658 = vmatpush3.bf16.xpose.msk.msra.mxu0 %vm767_vm1, %v653_v32 }
  0x36   :  { %661 = vmatprep.subr.msk.bf16.mxu0 %vm767_vm1, %v659_v35 }
  0x3d   :  { %664 = vmatpush3.bf16.xpose.msk.msra.mxu0 %vm767_vm1, %v659_v35 }
  0x44   :  { %587 = vmatmul.mubr.msk.f32.vlgmr.msra.gmra.mrb[0].mxu0 %vm71_vm0, %v44_v36 }
  0x45   :  { %589 = vmatprep.mubr.msk.f32.mxu0 %vm71_vm0, %v45_v37 }
  0x48   :  { %590 = vmatmul.mubr.msk.f32.gmra.mrb[2].mxu0 %vm71_vm0, %v46_v38 }
  0x84   :  { %v54_v40 = vpop.permute.xlu0 %53 }
  0x85   :  { %v64_v41 = vpop.permute.xlu1 %63 }
  0x88   :  { %v59_v42 = vpop.permute.xlu0 %58 }
  0x89   :  { %v69_v48 = vpop.permute.xlu1 %68 }
  0x8c   :  { %v232_v0 = vpop.permute.xlu0 %231 }
  0x8d   :  { %v237_v63 = vpop.permute.xlu1 %236 }
  0x90   :  { %v242_v9 = vpop.permute.xlu0 %241 }
  0x91   :  { %v247_v6 = vpop.permute.xlu1 %246 }
  0x94   :  { %v356_v18 = vpop.permute.xlu0 %355 }
 0x117   :  { %v588_v43 = vpop.f32.mrb[0].mxu0 }
 0x118   :  { %v204_v44 = vadd.f32 %v588_v43, %v59_v42  ;;  %v198_v45 = vpop.f32.mrb[1].mxu0 }
 0x119   :  { %v199_v46 = vadd.f32 %v198_v45, %v54_v40 }
 0x11a   :  { %v218_v47 = vmax.f32 %v204_v44, 0.0 }
 0x11b   :  { %v217_v49 = vmax.f32 %v199_v46, 0.0  ;;  %v591_v50 = vpop.f32.mrb[2].mxu0 }
 0x11c   :  { %v214_v51 = vadd.f32 %v591_v50, %v69_v48  ;;  %v208_v52 = vpop.f32.mrb[3].mxu0 }
 0x11d   :  { %v209_v53 = vadd.f32 %v208_v52, %v64_v41  ;;  %v665_v54 = vpack.c.bf16 %v218_v47, %v217_v49 }
 0x11e   :  { %v220_v55 = vmax.f32 %v214_v51, 0.0 }
 0x11f   :  { %v219_v56 = vmax.f32 %v209_v53, 0.0  ;;  %666 = vmatprep.subr.bf16.mxu1 %v665_v54 }
 0x120   :  { %668 = vmatpush3.bf16.msra.mxu1 %v665_v54 }
 0x121   :  { %v669_v57 = vpack.c.bf16 %v220_v55, %v219_v56 }
 0x123   :  { %670 = vmatprep.subr.bf16.mxu1 %v669_v57 }
 0x124   :  { %672 = vmatpush3.bf16.msra.mxu1 %v669_v57 }
 0x125   :  { %673 = vmatprep.subr.bf16.mxu1 %v713_v61 }
 0x127   :  { %601 = vmatmul.mubr.msk.f32.vlgmr.msra.gmra.mrb[0].mxu1 %vm249_vm2, %v222_v58 }
 0x128   :  { %603 = vmatprep.mubr.msk.f32.mxu1 %vm249_vm2, %v223_v59 }
 0x12b   :  { %604 = vmatmul.mubr.msk.f32.gmra.mrb[2].mxu1 %vm249_vm2, %v224_v60 }
 0x12c   :  { %614 = vmatprep.mubr.msk.f32.mxu1 %vm714_vm3, %v715_v62 }
 0x1fa   :  { %v602_v1 = vpop.f32.mrb[0].mxu1 }
 0x1fb   :  { %v334_v2 = vadd.f32 %v602_v1, %v237_v63  ;;  %v328_v3 = vpop.f32.mrb[1].mxu1 }
 0x1fc   :  { %v329_v4 = vadd.f32 %v328_v3, %v232_v0 }
 0x1fd   :  { %v348_v5 = vmax.f32 %v334_v2, 0.0 }
 0x1fe   :  { %v347_v7 = vmax.f32 %v329_v4, 0.0  ;;  %v605_v8 = vpop.f32.mrb[2].mxu1 }
 0x1ff   :  { %v344_v10 = vadd.f32 %v605_v8, %v247_v6  ;;  %v338_v11 = vpop.f32.mrb[3].mxu1 }
 0x200   :  { %v674_v12 = vpack.c.bf16 %v348_v5, %v347_v7  ;;  %v339_v13 = vadd.f32 %v338_v11, %v242_v9 }
 0x201   :  { %v350_v14 = vmax.f32 %v344_v10, 0.0 }
 0x202   :  { %v349_v15 = vmax.f32 %v339_v13, 0.0  ;;  %675 = vmatpush3.bf16.msra.mxu1 %v674_v12 }
 0x203   :  { %676 = vmatprep.subr.bf16.mxu1 %v713_v61 }
 0x204   :  { %v677_v16 = vpack.c.bf16 %v350_v14, %v349_v15 }
 0x206   :  { %678 = vmatpush3.bf16.msra.mxu1 %v677_v16 }
 0x209   :  { %615 = vmatmul.mubr.msk.f32.vlgmr.msra.gmra.mrb[4].mxu1 %vm249_vm2, %v351_v17 }
 0x2dc   :  { %v427_v19 = vpop.f32.mrb[4].mxu1 }
 0x2dd   :  { %v428_v20 = vadd.f32 %v427_v19, %v356_v18  ;;  %v616_v21 = vpop.f32.mrb[5].mxu1 }
 0x2df   :  { %431 = vxpose.xlu1.b32.start.end [1/1] (short) %v428_v20, 128 }
 0x35f   :  { %v447_v22 = vpop.trf.xlu1 }
 0x360   :  { %464 = vst.msk [vmem:[#allocation2] sm:$0xff] %vm463_vm4, %v447_v22 }
 0x363   :  { %v448_v23 = vpop.trf.xlu1 }
 0x364   :  { %465 = vst.msk [vmem:[#allocation2 + $0x8] sm:$0xff] %vm463_vm4, %v448_v23 }
 0x367   :  { %v449_v24 = vpop.trf.xlu1 }
 0x368   :  { %466 = vst.msk [vmem:[#allocation2 + $0x10] sm:$0xff] %vm463_vm4, %v449_v24 }
 0x36b   :  { %v450_v25 = vpop.trf.xlu1 }
 0x36c   :  { %467 = vst.msk [vmem:[#allocation2 + $0x18] sm:$0xff] %vm463_vm4, %v450_v25 }
 0x36f   :  { %v451_v26 = vpop.trf.xlu1 }
 0x370   :  { %468 = vst.msk [vmem:[#allocation2 + $0x20] sm:$0xff] %vm463_vm4, %v451_v26 }
 0x373   :  { %v452_v27 = vpop.trf.xlu1 }
 0x374   :  { %469 = vst.msk [vmem:[#allocation2 + $0x28] sm:$0xff] %vm463_vm4, %v452_v27 }
 0x377   :  { %v453_v28 = vpop.trf.xlu1 }
 0x378   :  { %470 = vst.msk [vmem:[#allocation2 + $0x30] sm:$0xff] %vm463_vm4, %v453_v28 }
 0x37b   :  { %v454_v29 = vpop.trf.xlu1 }
 0x37c   :  { %471 = vst.msk [vmem:[#allocation2 + $0x38] sm:$0xff] %vm463_vm4, %v454_v29 }
 0x37f   :  { %v455_v30 = vpop.trf.xlu1 }
 0x380   :  { %472 = vst.msk [vmem:[#allocation2 + $0x40] sm:$0xff] %vm463_vm4, %v455_v30 }
 0x383   :  { %v456_v31 = vpop.trf.xlu1 }
 0x384   :  { %473 = vst.msk [vmem:[#allocation2 + $0x48] sm:$0xff] %vm463_vm4, %v456_v31 }
 0x387   :  { %v457_v32 = vpop.trf.xlu1 }
 0x388   :  { %474 = vst.msk [vmem:[#allocation2 + $0x50] sm:$0xff] %vm463_vm4, %v457_v32 }
 0x38b   :  { %v458_v33 = vpop.trf.xlu1 }
 0x38c   :  { %475 = vst.msk [vmem:[#allocation2 + $0x58] sm:$0xff] %vm463_vm4, %v458_v33 }
 0x38f   :  { %v459_v34 = vpop.trf.xlu1 }
 0x390   :  { %476 = vst.msk [vmem:[#allocation2 + $0x60] sm:$0xff] %vm463_vm4, %v459_v34 }
 0x393   :  { %v460_v35 = vpop.trf.xlu1 }
 0x394   :  { %477 = vst.msk [vmem:[#allocation2 + $0x68] sm:$0xff] %vm463_vm4, %v460_v35 }
 0x397   :  { %v461_v36 = vpop.trf.xlu1 }
 0x398   :  { %478 = vst.msk [vmem:[#allocation2 + $0x70] sm:$0xff] %vm463_vm4, %v461_v36 }
 0x39b   :  { %v462_v37 = vpop.trf.xlu1 }
 0x39c   :  { %479 = vst.msk [vmem:[#allocation2 + $0x78] sm:$0xff] %vm463_vm4, %v462_v37 }
 0x39d   :  { %484 = vsyncadd [#allocation3], 1920  ;;  %s716_s5 = smov [#allocation2]  }
 0x39e   :  { %s485_s16 = sshll.u32 %s716_s5, 4  ;;  %s486_s16 = int_to_ptr.vmem [resolvable:$true] %s485_s16 }
 0x39f   :  { %s688_s4 = scalar_lea.vmem %s486_s16, 128  ;;  %s692_s17 = scalar_lea.vmem %s486_s16, 2048 }
 0x3a0   :  { %p689_p0 = scmp.ne.s32.totalorder %s486_s16, %s688_s4  ;;  %p693_p1 = scmp.lt.s32.totalorder %s486_s16, %s486_s16 }
 0x3a1   :  { %p694_p2 = scmp.lt.s32.totalorder %s692_s17, %s688_s4 }
 0x3a3   :  { %p695_p3 = por %p694_p2, %p693_p1 }
 0x3a5   :  { %p696_p4 = pnand %p695_p3, %p689_p0 }
 0x3a7   :  { %699 = shalt.err (!%p696_p4)
}
 0x3a8   :  { %s700_s19 = scalar_lea.hbm %s943_s7, 128 }
 0x3a9   :  { %p701_p5 = scmp.ne.s32.totalorder %s943_s7, %s700_s19  ;;  %p704_p6 = scmp.lt.u32.totalorder %s700_s19, %s943_s7 }
 0x3ab   :  { %p706_p7 = pnand %p704_p6, %p701_p5 }
 0x3ad   :  { %709 = shalt.err (!%p706_p7)
}
 0x3ae   :  { %s717_s24 = smov 128   ;;  %s718_s25 = smov 8  }
 0x3af   :  { %491 = dma.vmem_to_hbm [thread:$0]  %s486_s16, 128, %s943_s7, [#allocation3], %s717_s24, %s717_s24, %s718_s25  }
 0x3b0   :  { %710 = dma.done.wait [#allocation3], 2048  }
 0x3b1   :  { %711 = vsyncadd [#allocation3], 4294965248 }
 0x3b2   :  { %495 = vsyncpa [#allocation3], 1 }

</bundles_post_ra>
